<compile_context>
chip_gen: v6e
topology: v6e:2x2x1
jax: 0.10.0
libtpu: 0.0.40
codegen_flags: <defaults>
</compile_context>

<pallas_src>
import jax
import jax.numpy as jnp
from jax.experimental import pallas as pl
from jax.experimental.pallas import tpu as pltpu


def _round_up(a, b):
    return ((a + b - 1) // b) * b


def _deconv_kernel(xe_ref, w_ref, khm_ref, kwm_ref, o_ref):
    # xe_ref : (Cin+1, ts)       2x2-(H,W)-expanded x block (+ ones row for the bias fold)
    # w_ref  : (4, Nrow, Cin+1)  weights per (kh,kw) class (+ bias column); rows = co*2 + kd
    # khm_ref: (1, ts) int32     kh parity of each output lane
    # kwm_ref: (1, ts) int32     kw parity of each output lane
    # o_ref  : (Nrow, ts)        lanes already (d, h, kh, w, kw)-interleaved
    xe = xe_ref[...]
    kh0 = khm_ref[...] == 0
    kw0 = kwm_ref[...] == 0
    # One GEMM per (kh, kw) class; contraction dim is tiny (Cin+1) -- MXU has plenty of slack.
    y00 = jnp.dot(w_ref[0], xe, preferred_element_type=jnp.float32)   # (kh, kw) = (0, 0)
    y01 = jnp.dot(w_ref[1], xe, preferred_element_type=jnp.float32)   # (0, 1)
    ya = jnp.where(kw0, y00, y01)
    y10 = jnp.dot(w_ref[2], xe, preferred_element_type=jnp.float32)   # (1, 0)
    y11 = jnp.dot(w_ref[3], xe, preferred_element_type=jnp.float32)   # (1, 1)
    yb = jnp.where(kw0, y10, y11)
    y = jnp.where(kh0, ya, yb)
    # LeakyReLU(negative_slope=0.01); bias already folded in via the ones channel.
    o_ref[...] = jnp.where(y > 0, y, 0.01 * y).astype(o_ref.dtype)


def upsampling_deconv_block(x, weight, bias, *, tile_s=1024):
    """ConvTranspose3d(Cin, Cout, kernel=2, stride=2, pad=0) + LeakyReLU(0.01).

    x:      (N, Cin, D, H, W)        (NCDHW, like PyTorch)
    weight: (Cin, Cout, 2, 2, 2)     (PyTorch ConvTranspose3d layout)
    bias:   (Cout,)
    returns (N, Cout, 2D, 2H, 2W)    same dtype as x
    """
    N, Cin, D, H, W = x.shape
    Cin_w, Cout, kd_, kh_, kw_ = weight.shape
    assert Cin_w == Cin and (kd_, kh_, kw_) == (2, 2, 2), "expects ConvTranspose3d(k=2, s=2, p=0)"
    S = D * H * W
    L = 4 * S                      # output lanes per kd: (d, h, kh, w, kw)
    Cinp = Cin + 1                 # + ones channel for the bias fold
    Nrow = 2 * Cout                # rows = co*2 + kd
    out_dtype = x.dtype
    isz = jnp.dtype(out_dtype).itemsize

    # ---- input prep (cheap: all on the input side, 8x smaller than the output) ----------
    ones = jnp.ones((N, 1, D, H, W), x.dtype)
    x1 = jnp.concatenate([x, ones], axis=1)                              # (N, Cin+1, D, H, W)
    # nearest-neighbour 2x2 expansion over (H, W): lanes become (d, h, kh, w, kw)
    xe = jnp.broadcast_to(x1[:, :, :, :, None, :, None],
                          (N, Cinp, D, H, 2, W, 2)).reshape(N, Cinp, L)

    # weights -> (class = kh*2+kw, row = co*2+kd, Cin+1), bias in the last column
    wt = jnp.transpose(weight, (1, 2, 3, 4, 0))                          # (Cout, 2, 2, 2, Cin)
    bcol = jnp.broadcast_to(bias.astype(wt.dtype)[:, None, None, None, None],
                            (Cout, 2, 2, 2, 1))
    wb = jnp.concatenate([wt, bcol], axis=-1)                            # (Cout, 2, 2, 2, Cin+1)
    wall = jnp.transpose(wb, (2, 3, 0, 1, 4)).reshape(4, Nrow, Cinp).astype(x.dtype)

    # per-lane (kh, kw) ids for the in-kernel selects
    lane = jnp.arange(L, dtype=jnp.int32)
    kh_id = ((lane % (4 * W)) // (2 * W))[None, :]                       # (1, L)
    kw_id = (lane % 2)[None, :]                                          # (1, L)

    # ---- lane-tile sizing ----------------------------------------------------------------
    # Double-buffered in/out blocks + ~3 f32-sized temporaries of the output block + masks.
    per_lane = 2 * Cinp * isz + 2 * Nrow * isz + 3 * Nrow * 4 + 4 * 4
    budget = 10 * 1024 * 1024      # per-step working-set target; safe on v5e/v6e/v7x
    if L <= 128:
        ts = L                                                            # full-lane block
    else:
        ts = min(_round_up(tile_s, 128), max(128, (budget // per_lane) // 128 * 128))
        if ts >= L:
            ts = L
        # v7x has 2 TensorCores sharded over "parallel" grid axes: aim for >= 4 grid steps.
        while N * pl.cdiv(L, ts) < 4 and ts > 128:
            new_ts = max(128, ((ts // 2) // 128) * 128)
            if new_ts == ts:
                break
            ts = new_ts

    nblk = pl.cdiv(L, ts)          # partial last block handled by Pallas masking (no jnp.pad)
    grid = (N, nblk)

    cost = pl.CostEstimate(
        flops=2 * 4 * N * Nrow * Cinp * L,
        transcendentals=0,
        bytes_accessed=N * L * (Cinp + Nrow) * isz + 4 * Nrow * Cinp * isz + 2 * L * 4,
    )

    y = pl.pallas_call(
        _deconv_kernel,
        out_shape=jax.ShapeDtypeStruct((N, Nrow, L), out_dtype),
        grid_spec=pltpu.PrefetchScalarGridSpec(
            num_scalar_prefetch=0,
            grid=grid,
            in_specs=[
                pl.BlockSpec((None, Cinp, ts), lambda n, j: (n, 0, j)),   # expanded x
                pl.BlockSpec((4, Nrow, Cinp), lambda n, j: (0, 0, 0)),    # weights (resident)
                pl.BlockSpec((1, ts), lambda n, j: (0, j)),               # kh parity per lane
                pl.BlockSpec((1, ts), lambda n, j: (0, j)),               # kw parity per lane
            ],
            out_specs=pl.BlockSpec((None, Nrow, ts), lambda n, j: (n, 0, j)),
        ),
        compiler_params=pltpu.CompilerParams(
            dimension_semantics=("parallel", "parallel"),
            vmem_limit_bytes=40 * 1024 * 1024,
        ),
        cost_estimate=cost,
    )(xe, wall, kh_id, kw_id)

    # (n, (co,kd), (d, 2h+kh, 2w+kw)) -> NCDHW.  Both reshapes are free/contiguous; the
    # transpose only swaps kd with the d blocks, moving contiguous 4*H*W-element runs.
    y = y.reshape(N, Cout, 2, D, 2 * H, 2 * W)
    y = jnp.transpose(y, (0, 1, 3, 2, 4, 5))
    return y.reshape(N, Cout, 2 * D, 2 * H, 2 * W)


def _reference(x, weight, bias):
    """Plain-JAX reference of ConvTranspose3d(k=2, s=2, p=0) + LeakyReLU(0.01)."""
    N, Cin, D, H, W = x.shape
    _, Cout = weight.shape[:2]
    out = jnp.zeros((N, Cout, 2 * D, 2 * H, 2 * W), jnp.float32)
    for a in range(2):
        for b in range(2):
            for c in range(2):
                contrib = jnp.einsum("ncdhw,ck->nkdhw", x, weight[:, :, a, b, c])
                out = out.at[:, :, a::2, b::2, c::2].set(contrib)
    out = out + bias[None, :, None, None, None]
    return jnp.where(out > 0, out, 0.01 * out)


if __name__ == "__main__":
    key = jax.random.PRNGKey(0)
    k_x, k_w, k_b, k_x2, k_w2, k_b2, k_x3, k_w3, k_b3 = jax.random.split(key, 9)

    # Test 1: batch=2, n_filters_in=4, n_filters_out=16, spatial=4^3 (128-lane tiles, 4 steps)
    N, Cin, Cout, D, H, W = 2, 4, 16, 4, 4, 4
    x = jax.random.normal(k_x, (N, Cin, D, H, W), jnp.float32)
    weight = jax.random.normal(k_w, (Cin, Cout, 2, 2, 2), jnp.float32) * 0.1
    bias = jax.random.normal(k_b, (Cout,), jnp.float32) * 0.1
    out = jax.block_until_ready(upsampling_deconv_block(x, weight, bias))
    ref = _reference(x, weight, bias)
    assert out.shape == (N, Cout, 2 * D, 2 * H, 2 * W)
    assert jnp.allclose(out, ref, atol=1e-5, rtol=1e-5), "mismatch vs reference (test 1)"

    # Test 2: small full-lane block (L = 108 < 128), Cout*2 on sublanes.
    N2, Cin2, Cout2, D2, H2, W2 = 1, 4, 8, 3, 3, 3
    x2 = jax.random.normal(k_x2, (N2, Cin2, D2, H2, W2), jnp.float32)
    weight2 = jax.random.normal(k_w2, (Cin2, Cout2, 2, 2, 2), jnp.float32) * 0.1
    bias2 = jax.random.normal(k_b2, (Cout2,), jnp.float32) * 0.1
    out2 = jax.block_until_ready(upsampling_deconv_block(x2, weight2, bias2))
    ref2 = _reference(x2, weight2, bias2)
    assert out2.shape == (N2, Cout2, 2 * D2, 2 * H2, 2 * W2)
    assert jnp.allclose(out2, ref2, atol=1e-5, rtol=1e-5), "mismatch vs reference (test 2)"

    # Test 3: exercises the padding-free partial last lane block (L = 192, ts = 128).
    N3, Cin3, Cout3, D3, H3, W3 = 1, 6, 8, 3, 4, 4
    x3 = jax.random.normal(k_x3, (N3, Cin3, D3, H3, W3), jnp.float32)
    weight3 = jax.random.normal(k_w3, (Cin3, Cout3, 2, 2, 2), jnp.float32) * 0.1
    bias3 = jax.random.normal(k_b3, (Cout3,), jnp.float32) * 0.1
    out3 = jax.block_until_ready(upsampling_deconv_block(x3, weight3, bias3))
    ref3 = _reference(x3, weight3, bias3)
    assert out3.shape == (N3, Cout3, 2 * D3, 2 * H3, 2 * W3)
    assert jnp.allclose(out3, ref3, atol=1e-5, rtol=1e-5), "mismatch vs reference (test 3)"

    print("KERNEL_OK")
</pallas_src>

<mosaic_0001>
module attributes {stable_mosaic.version = 11 : i64} {
  func.func @_deconv_kernel(%arg0: i32, %arg1: i32, %arg2: memref<1x5x128xf32, #tpu.memory_space<vmem>>, %arg3: memref<4x32x5xf32, #tpu.memory_space<vmem>>, %arg4: memref<1x128xi32, #tpu.memory_space<vmem>>, %arg5: memref<1x128xi32, #tpu.memory_space<vmem>>, %arg6: memref<1x32x128xf32, #tpu.memory_space<vmem>>) attributes {dimension_semantics = [#tpu.dimension_semantics<parallel>, #tpu.dimension_semantics<parallel>], iteration_bounds = array<i64: 2, 2>, scalar_prefetch = 0 : i64, scratch_operands = 0 : i64, tpu.core_type = #tpu.core_type<tc>, window_params = [{transform_indices = @transform_0, window_bounds = array<i64: 1, 5, 128>}, {pipeline_mode = #tpu.pipeline_mode<synchronous>, transform_indices = @transform_1, window_bounds = array<i64: 4, 32, 5>}, {transform_indices = @transform_2, window_bounds = array<i64: 1, 128>}, {transform_indices = @transform_3, window_bounds = array<i64: 1, 128>}, {transform_indices = @transform_4, window_bounds = array<i64: 1, 32, 128>}]} {
    %c0 = arith.constant 0 : index
    %c0_0 = arith.constant 0 : index
    %c0_1 = arith.constant 0 : index
    %0 = vector.load %arg2[%c0, %c0_0, %c0_1] : memref<1x5x128xf32, #tpu.memory_space<vmem>>, vector<1x5x128xf32>
    %1 = vector.shape_cast %0 : vector<1x5x128xf32> to vector<5x128xf32>
    %c0_2 = arith.constant 0 : index
    %c0_3 = arith.constant 0 : index
    %2 = vector.load %arg4[%c0_2, %c0_3] : memref<1x128xi32, #tpu.memory_space<vmem>>, vector<1x128xi32>
    %c0_i32 = arith.constant 0 : i32
    %3 = vector.broadcast %c0_i32 : i32 to vector<1x128xi32>
    %4 = arith.cmpi eq, %2, %3 : vector<1x128xi32>
    %c0_4 = arith.constant 0 : index
    %c0_5 = arith.constant 0 : index
    %5 = vector.load %arg5[%c0_4, %c0_5] : memref<1x128xi32, #tpu.memory_space<vmem>>, vector<1x128xi32>
    %c0_i32_6 = arith.constant 0 : i32
    %6 = vector.broadcast %c0_i32_6 : i32 to vector<1x128xi32>
    %7 = arith.cmpi eq, %5, %6 : vector<1x128xi32>
    %c0_7 = arith.constant 0 : index
    %c0_8 = arith.constant 0 : index
    %c0_9 = arith.constant 0 : index
    %8 = vector.load %arg3[%c0_7, %c0_8, %c0_9] : memref<4x32x5xf32, #tpu.memory_space<vmem>>, vector<1x32x5xf32>
    %9 = vector.shape_cast %8 : vector<1x32x5xf32> to vector<32x5xf32>
    %cst = arith.constant dense<0.000000e+00> : vector<32x128xf32>
    %10 = tpu.matmul %9, %1, %cst {dimension_numbers = #tpu.dot_dimension_numbers<[1], [0], [0], [1], [0, 0, 1, 1], [], []>} : vector<32x5xf32>, vector<5x128xf32>, vector<32x128xf32> -> vector<32x128xf32>
    %c1 = arith.constant 1 : index
    %c0_10 = arith.constant 0 : index
    %c0_11 = arith.constant 0 : index
    %11 = vector.load %arg3[%c1, %c0_10, %c0_11] : memref<4x32x5xf32, #tpu.memory_space<vmem>>, vector<1x32x5xf32>
    %12 = vector.shape_cast %11 : vector<1x32x5xf32> to vector<32x5xf32>
    %cst_12 = arith.constant dense<0.000000e+00> : vector<32x128xf32>
    %13 = tpu.matmul %12, %1, %cst_12 {dimension_numbers = #tpu.dot_dimension_numbers<[1], [0], [0], [1], [0, 0, 1, 1], [], []>} : vector<32x5xf32>, vector<5x128xf32>, vector<32x128xf32> -> vector<32x128xf32>
    %14 = vector.shape_cast %7 : vector<1x128xi1> to vector<1x128xi1>
    %15 = vector.broadcast %14 : vector<1x128xi1> to vector<32x128xi1>
    %16 = arith.select %15, %10, %13 : vector<32x128xi1>, vector<32x128xf32>
    %c2 = arith.constant 2 : index
    %c0_13 = arith.constant 0 : index
    %c0_14 = arith.constant 0 : index
    %17 = vector.load %arg3[%c2, %c0_13, %c0_14] : memref<4x32x5xf32, #tpu.memory_space<vmem>>, vector<1x32x5xf32>
    %18 = vector.shape_cast %17 : vector<1x32x5xf32> to vector<32x5xf32>
    %cst_15 = arith.constant dense<0.000000e+00> : vector<32x128xf32>
    %19 = tpu.matmul %18, %1, %cst_15 {dimension_numbers = #tpu.dot_dimension_numbers<[1], [0], [0], [1], [0, 0, 1, 1], [], []>} : vector<32x5xf32>, vector<5x128xf32>, vector<32x128xf32> -> vector<32x128xf32>
    %c3 = arith.constant 3 : index
    %c0_16 = arith.constant 0 : index
    %c0_17 = arith.constant 0 : index
    %20 = vector.load %arg3[%c3, %c0_16, %c0_17] : memref<4x32x5xf32, #tpu.memory_space<vmem>>, vector<1x32x5xf32>
    %21 = vector.shape_cast %20 : vector<1x32x5xf32> to vector<32x5xf32>
    %cst_18 = arith.constant dense<0.000000e+00> : vector<32x128xf32>
    %22 = tpu.matmul %21, %1, %cst_18 {dimension_numbers = #tpu.dot_dimension_numbers<[1], [0], [0], [1], [0, 0, 1, 1], [], []>} : vector<32x5xf32>, vector<5x128xf32>, vector<32x128xf32> -> vector<32x128xf32>
    %23 = vector.shape_cast %7 : vector<1x128xi1> to vector<1x128xi1>
    %24 = vector.broadcast %23 : vector<1x128xi1> to vector<32x128xi1>
    %25 = arith.select %24, %19, %22 : vector<32x128xi1>, vector<32x128xf32>
    %26 = vector.shape_cast %4 : vector<1x128xi1> to vector<1x128xi1>
    %27 = vector.broadcast %26 : vector<1x128xi1> to vector<32x128xi1>
    %28 = arith.select %27, %16, %25 : vector<32x128xi1>, vector<32x128xf32>
    %cst_19 = arith.constant 0.000000e+00 : f32
    %29 = vector.broadcast %cst_19 : f32 to vector<32x128xf32>
    %30 = arith.cmpf ogt, %28, %29 : vector<32x128xf32>
    %cst_20 = arith.constant 0.00999999977 : f32
    %31 = vector.broadcast %cst_20 : f32 to vector<32x128xf32>
    %32 = arith.mulf %31, %28 : vector<32x128xf32>
    %33 = arith.select %30, %28, %32 : vector<32x128xi1>, vector<32x128xf32>
    %c0_21 = arith.constant 0 : index
    %c0_22 = arith.constant 0 : index
    %c0_23 = arith.constant 0 : index
    %34 = vector.load %arg6[%c0_21, %c0_22, %c0_23] : memref<1x32x128xf32, #tpu.memory_space<vmem>>, vector<1x32x128xf32>
    %35 = vector.shape_cast %34 : vector<1x32x128xf32> to vector<32x128xf32>
    %36 = vector.shape_cast %33 : vector<32x128xf32> to vector<1x32x128xf32>
    tpu.vector_store %arg6[%c0_21, %c0_22, %c0_23], %36 {strides = array<i32>} : memref<1x32x128xf32, #tpu.memory_space<vmem>>, vector<1x32x128xf32>,
    return
  }
  func.func @transform_0(%arg0: i32, %arg1: i32) -> (i32, i32, i32) {
    %c0_i32 = arith.constant 0 : i32
    %c0_i32_0 = arith.constant 0 : i32
    return %arg0, %c0_i32, %arg1 : i32, i32, i32
  }
  func.func @transform_1(%arg0: i32, %arg1: i32) -> (i32, i32, i32) {
    %c0_i32 = arith.constant 0 : i32
    %c0_i32_0 = arith.constant 0 : i32
    %c0_i32_1 = arith.constant 0 : i32
    %c0_i32_2 = arith.constant 0 : i32
    return %c0_i32, %c0_i32_0, %c0_i32_1 : i32, i32, i32
  }
  func.func @transform_2(%arg0: i32, %arg1: i32) -> (i32, i32) {
    %c0_i32 = arith.constant 0 : i32
    %c0_i32_0 = arith.constant 0 : i32
    return %c0_i32, %arg1 : i32, i32
  }
  func.func @transform_3(%arg0: i32, %arg1: i32) -> (i32, i32) {
    %c0_i32 = arith.constant 0 : i32
    %c0_i32_0 = arith.constant 0 : i32
    return %c0_i32, %arg1 : i32, i32
  }
  func.func @transform_4(%arg0: i32, %arg1: i32) -> (i32, i32, i32) {
    %c0_i32 = arith.constant 0 : i32
    %c0_i32_0 = arith.constant 0 : i32
    return %arg0, %c0_i32, %arg1 : i32, i32, i32
  }
}

</mosaic_0001>

<bundles_post_ra>
// kernel: tpu_custom_call.1
= control target key start
LH: loop header
LB: loop body
LE: loop exit
PB: predicated region body
PF: predicated region fallthrough
CT: control target
= control target key end

     0   :  { %9 = vsyncpa [#allocation3], 0  ;;  %s1354_s0 = inlined_call_operand.vmem [shape: f32[2,5,256], index: 0, kind: input, shape index: {}]   ;;  %s1355_s1 = inlined_call_operand.vmem [shape: f32[4,32,5], index: 1, kind: input, shape index: {}]   ;;  %s1356_s2 = inlined_call_operand.vmem [shape: s32[1,256], index: 2, kind: input, shape index: {}]   ;;  %s1357_s3 = inlined_call_operand.vmem [shape: s32[1,256], index: 3, kind: input, shape index: {}]   ;;  %s1358_s4 = inlined_call_operand.hbm [shape: f32[2,32,256], index: 4, kind: output, shape index: {}]  }
   0x1   :  { %11 = vsyncpa [#allocation3 + $0x1], 0  ;;  %s1116_s15 = smov 0   ;;  %s1118_s16 = smov 0  }
   0x2   :  { %s1120_s17 = smov 0   ;;  %s1122_s18 = smov 0  }
   0x3   :  { %s1124_s19 = smov 0   ;;  %s1126_s20 = smov 0  }
   0x4   :  { %s1128_s21 = smov 0   ;;  %s1130_s22 = smov 0  }
   0x5 LB: > { %s820_s23 = sadd.s32 4294967295, %s1084_s22   ;;  %s821_s24 = sadd.s32 4294967294, %s1084_s22   ;;  %s1084_s22 = sphi %s1130_s22, %s17_s22   ;;  %s1080_s21 = sphi %s1128_s21, %s1367_s21   ;;  %s1076_s20 = sphi %s1126_s20, %s1366_s20   ;;  %s1072_s19 = sphi %s1124_s19, %s1365_s19   ;;  %s1068_s18 = sphi %s1122_s18, %s1364_s18   ;;  %s1064_s17 = sphi %s1120_s17, %s1363_s17   ;;  %s1060_s16 = sphi %s1118_s16, %s1362_s16   ;;  %s1056_s15 = sphi %s1116_s15, %s1361_s15  }
   0x6   : > { %s26_s25 = sadd.s32 1, %s1076_s20  ;;  %s29_s26 = sadd.s32 1, %s1080_s21 }
   0x7   : > { %p27_p0 = scmp.ge.s32.totalorder %s26_s25, 2  ;;  %p149_p1 = scmp.ne.s32.totalorder %s1064_s17, %s1060_s16 }
   0x8   : > { %p150_p2 = scmp.eq.s32.totalorder %s820_s23, 3  ;;  %p155_p5 = scmp.ne.s32.totalorder %s1060_s16, %s1056_s15 }
   0x9   : > { %s1369_s25 = smov (%p27_p0, %s26_s25), 0  ;;  %s1371_s26 = smov (!%p27_p0, %s29_s26), %s1080_s21 }
   0xa   : > { %s135_s27 = ssub.s32 %s1076_s20, %s1369_s25  ;;  %p1167_p3 = por %p150_p2, %p149_p1 }
   0xb   : > { %p31_p4 = scmp.ge.s32.totalorder %s1371_s26, 2  ;;  %p156_p6 = scmp.eq.s32.totalorder %s821_s24, 3 }
   0xc   : > { %p824_p7 = scmp.ge.s32.totalorder %s1084_s22, 1  ;;  %p200_p9 = scmp.lt.s32.totalorder %s1084_s22, 5 }
   0xd   : > { %s1373_s26 = smov (%p31_p4, %s1371_s26), 0  ;;  %p1176_p8 = por %p156_p6, %p155_p5 }
   0xe   : > { %s134_s30 = ssub.s32 %s1080_s21, %s1373_s26  ;;  %s139_s5 = sadd.s32 1, %s1064_s17 }
   0xf   : > { %s136_s6 = sor.u32 %s135_s27, %s134_s30  ;;  %p201_p10 = pnand %p824_p7, %p200_p9 }
  0x10   : > { %p137_p11 = scmp.eq.s32.totalorder %s136_s6, 0  ;;  %p235_p12 = scmp.lt.s32.totalorder (!%p201_p10), %s1072_s19, 1 }
  0x11   : > { %204 = sbr.rel (%p201_p10) target bundleno = 258 (0x102), region = 36  ;;  %p237_p13 = scmp.lt.s32.totalorder (!%p201_p10), %s1068_s18, 1 }
  0x12   : > { %s1185_s7 = scalar_select %p137_p11, %s1064_s17, %s139_s5  }
  0x16   : > { %v254_v0 = vld [vmem:[%s1355_s1] sm:$0xff]  ;;  %vm258_vm0 = vcmask 39936   ;;  %s236_s12 = scalar_select %p235_p12, %s1072_s19, 1  ;;  %vm271_vm1 = vcmask 1044480   ;;  %v255_v3 = vld [vmem:[%s1355_s1 + $0x8] sm:$0xff]  ;;  %v256_v5 = vld [vmem:[%s1355_s1 + $0x10] sm:$0xff]  ;;  %v463_v17 = vlaneseq }
  0x17   : > { %v833_v1 = vld [vmem:[%s1355_s1 + $0x20] sm:$0xff]  ;;  %887 = vmatprep.mubr.msk.f32.mxu0 %vm258_vm0, %v254_v0  ;;  %s1199_s13 = scalar_select %p237_p13, %s1068_s18, 1  ;;  %v834_v4 = vld [vmem:[%s1355_s1 + $0x28] sm:$0xff]  ;;  %v835_v6 = vld [vmem:[%s1355_s1 + $0x30] sm:$0xff]  ;;  %v1086_v22 = vmov 0  }
  0x18   : > { %895 = vmatprep.mubr.msk.f32.mxu1 %vm258_vm0, %v833_v1  ;;  %s826_s14 = sshll.u32 %s236_s12, 1  ;;  %v257_v7 = vld [vmem:[%s1355_s1 + $0x18] sm:$0xff]  ;;  %v842_v9 = vld [vmem:[%s1355_s1 + $0x40] sm:$0xff]  ;;  %v843_v11 = vld [vmem:[%s1355_s1 + $0x48] sm:$0xff]  ;;  %v464_v19 = vshrl.u32 %v463_v17, 7 }
  0x19   : > { %s240_s23 = sadd.s32 %s826_s14, %s1199_s13  ;;  %v836_v8 = vld [vmem:[%s1355_s1 + $0x38] sm:$0xff]  ;;  %v851_v10 = vld [vmem:[%s1355_s1 + $0x60] sm:$0xff]  ;;  %v852_v12 = vld [vmem:[%s1355_s1 + $0x68] sm:$0xff]  ;;  %s248_s14 = scalar_lea.vmem %s1357_s3, %s1199_s13 }
  0x1a   : > { %s827_s24 = sshll.u32 %s240_s23, 3  ;;  %v844_v13 = vld [vmem:[%s1355_s1 + $0x50] sm:$0xff]  ;;  %v845_v15 = vld [vmem:[%s1355_s1 + $0x58] sm:$0xff]  ;;  %s245_s27 = scalar_lea.vmem %s1356_s2, %s1199_s13  ;;  %v252_v18 = vld [vmem:[%s248_s14] sm:$0x1]  ;;  %v465_v21 = vsub.s32 0, %v464_v19 }
  0x1b   : > { %s242_s5 = scalar_lea.vmem %s1354_s0, %s827_s24  ;;  %v853_v14 = vld [vmem:[%s1355_s1 + $0x70] sm:$0xff]  ;;  %v854_v16 = vld [vmem:[%s1355_s1 + $0x78] sm:$0xff]  ;;  %v250_v20 = vld [vmem:[%s245_s27] sm:$0x1]  ;;  %vm253_vm2 = vcmp.eq.s32.totalorder %v252_v18, 0  ;;  %s232_s13 = sand.u32 1, %s1060_s16  }
  0x1c   : > { %v249_v2 = vld [vmem:[%s242_s5] sm:$0x1f]  ;;  %vm251_vm3 = vcmp.eq.s32.totalorder %v250_v20, 0  ;;  %v462_v23 = vsel %vm253_vm2, 1, %v1086_v22  ;;  %s825_s30 = sshll.u32 %s232_s13, 5  ;;  %s861_s5 = sshll.u32 %s1072_s19, 3 }
  0x1d   : > { %885 = vmatprep.subr.msk.mxu0 %vm271_vm1, %v249_v2  ;;  %893 = vmatprep.subr.msk.mxu1 %vm271_vm1, %v249_v2  ;;  %v680_v26 = vsel %vm251_vm3, 1, %v1086_v22  ;;  %v466_v27 = vrot.slane %v462_v23, %v465_v21  ;;  %s718_s6 = sadd.s32 %s1068_s18, %s861_s5  ;;  %s234_s19 = scalar_lea.vmem [#allocation2], %s825_s30 }
  0x1e   : > { %886 = vmatpush3.msk.msra.mxu0 %vm271_vm1, %v249_v2  ;;  %894 = vmatpush3.msk.msra.mxu1 %vm271_vm1, %v249_v2  ;;  %v684_v30 = vrot.slane %v680_v26, %v465_v21  ;;  %s721_s8 = sshll.u32 %s234_s19, 4  ;;  %s862_s18 = sshll.u32 %s718_s6, 7  ;;  %s1293_s8 = int_to_ptr.vmem [resolvable:$true] %s721_s8 }
  0x1f   : > { %888 = vmatmul.mubr.msk.f32.vlgmr.msra.gmra.mxu0 %vm258_vm0, %v255_v3  ;;  %896 = vmatmul.mubr.msk.f32.vlgmr.msra.gmra.mxu1 %vm258_vm0, %v834_v4  ;;  %vm467_vm4 = vcmp.eq.s32.totalorder %v466_v27, 1  ;;  %s1299_s11 = scalar_lea.hbm %s1358_s4, %s862_s18  ;;  %s1303_s12 = scalar_lea.sflag [#allocation3], %s232_s13 }
  0x20   : > { %901 = vmatprep.subr.msk.mxu0 %vm271_vm1, %v249_v2  ;;  %909 = vmatprep.subr.msk.mxu1 %vm271_vm1, %v249_v2  ;;  %vm685_vm5 = vcmp.eq.s32.totalorder %v684_v30, 1  ;;  %s992_s14 = scalar_lea.vmem %s1293_s8, 512  ;;  %s1087_s23 = smov [#allocation2]  }
  0x21   : > { %902 = vmatpush3.msk.msra.mxu0 %vm271_vm1, %v249_v2  ;;  %910 = vmatpush3.msk.msra.mxu1 %vm271_vm1, %v249_v2  ;;  %p993_p0 = scmp.ne.s32.totalorder %s1293_s8, %s992_s14  ;;  %s996_s24 = sshll.u32 %s1087_s23, 4  ;;  %s997_s24 = int_to_ptr.vmem [resolvable:$false] %s996_s24 }
  0x22   : > { %890 = vmatprep.mubr.msk.f32.mxu0 %vm258_vm0, %v256_v5  ;;  %898 = vmatprep.mubr.msk.f32.mxu1 %vm258_vm0, %v835_v6  ;;  %s998_s27 = scalar_lea.vmem %s997_s24, 1024  ;;  %p999_p4 = scmp.lt.s32.totalorder %s1293_s8, %s997_s24 }
  0x23   : > { %891 = vmatmul.mubr.msk.f32.gmra.mxu0 %vm258_vm0, %v257_v7  ;;  %899 = vmatmul.mubr.msk.f32.gmra.mxu1 %vm258_vm0, %v836_v8  ;;  %p994_p1 = pnand %p993_p0, %p1167_p3  ;;  %p1000_p5 = scmp.lt.s32.totalorder %s998_s27, %s992_s14 }
  0x24   : > { %903 = vmatprep.mubr.msk.f32.mxu0 %vm258_vm0, %v842_v9  ;;  %911 = vmatprep.mubr.msk.f32.mxu1 %vm258_vm0, %v851_v10 }
  0x25   : > { %p995_p2 = pneg %p994_p1  ;;  %p1001_p6 = por %p1000_p5, %p999_p4 }
  0x27   : > { %904 = vmatmul.mubr.msk.f32.vlgmr.msra.gmra.mxu0 %vm258_vm0, %v843_v11  ;;  %912 = vmatmul.mubr.msk.f32.vlgmr.msra.gmra.mxu1 %vm258_vm0, %v852_v12  ;;  %p1002_p7 = pnand %p1001_p6, %p995_p2 }
  0x28   : > { %906 = vmatprep.mubr.msk.f32.mxu0 %vm258_vm0, %v844_v13  ;;  %914 = vmatprep.mubr.msk.f32.mxu1 %vm258_vm0, %v853_v14 }
  0x2b   : > { %907 = vmatmul.mubr.msk.f32.gmra.mxu0 %vm258_vm0, %v845_v15  ;;  %915 = vmatmul.mubr.msk.f32.gmra.mxu1 %vm258_vm0, %v854_v16 }
  0xdf   : > { %v889_v24 = vpop.f32.mrf.mxu0  ;;  %v897_v25 = vpop.f32.mrf.mxu1 }
  0xe0   : > { %v469_v37 = vsel %vm467_vm4, %v889_v24, %v897_v25 }
  0xe1   : > { %v341_v28 = vpop.f32.mrf.mxu0  ;;  %v443_v29 = vpop.f32.mrf.mxu1 }
  0xe2   : > { %v468_v42 = vsel %vm467_vm4, %v341_v28, %v443_v29 }
  0xe3   : > { %v892_v31 = vpop.f32.mrf.mxu0  ;;  %v900_v32 = vpop.f32.mrf.mxu1 }
  0xe4   : > { %v471_v45 = vsel %vm467_vm4, %v892_v31, %v900_v32 }
  0xe5   : > { %v351_v33 = vpop.f32.mrf.mxu0  ;;  %v453_v34 = vpop.f32.mrf.mxu1 }
  0xe6   : > { %v470_v52 = vsel %vm467_vm4, %v351_v33, %v453_v34 }
  0xe7   : > { %v905_v35 = vpop.f32.mrf.mxu0  ;;  %v913_v36 = vpop.f32.mrf.mxu1 }
  0xe8   : > { %v677_v38 = vsel %vm467_vm4, %v905_v35, %v913_v36 }
  0xe9   : > { %v687_v39 = vsel %vm685_vm5, %v469_v37, %v677_v38  ;;  %v555_v40 = vpop.f32.mrf.mxu0  ;;  %v657_v41 = vpop.f32.mrf.mxu1 }
  0xea   : > { %vm691_vm6 = vcmp.gt.f32.partialorder %v687_v39, 0.0  ;;  %v695_v43 = vmul.f32 0.01, %v687_v39  ;;  %v676_v44 = vsel %vm467_vm4, %v555_v40, %v657_v41 }
  0xeb   : > { %v686_v46 = vsel %vm685_vm5, %v468_v42, %v676_v44  ;;  %v908_v47 = vpop.f32.mrf.mxu0  ;;  %v916_v48 = vpop.f32.mrf.mxu1 }
  0xec   : > { %v699_v49 = vsel %vm691_vm6, %v687_v39, %v695_v43  ;;  %vm690_vm7 = vcmp.gt.f32.partialorder %v686_v46, 0.0  ;;  %v694_v50 = vmul.f32 0.01, %v686_v46  ;;  %v679_v51 = vsel %vm467_vm4, %v908_v47, %v916_v48 }
  0xed   : > { %703 = vst [vmem:[%s234_s19 + $0x8] sm:$0xff] %v699_v49  ;;  %v689_v53 = vsel %vm685_vm5, %v471_v45, %v679_v51  ;;  %v565_v54 = vpop.f32.mrf.mxu0  ;;  %v667_v55 = vpop.f32.mrf.mxu1 }
  0xee   : > { %v698_v56 = vsel %vm690_vm7, %v686_v46, %v694_v50  ;;  %vm693_vm8 = vcmp.gt.f32.partialorder %v689_v53, 0.0  ;;  %v697_v57 = vmul.f32 0.01, %v689_v53  ;;  %v678_v58 = vsel %vm467_vm4, %v565_v54, %v667_v55 }
  0xef   : > { %702 = vst [vmem:[%s234_s19] sm:$0xff] %v698_v56  ;;  %v688_v59 = vsel %vm685_vm5, %v470_v52, %v678_v58 }
  0xf0   : > { %v701_v60 = vsel %vm693_vm8, %v689_v53, %v697_v57  ;;  %vm692_vm9 = vcmp.gt.f32.partialorder %v688_v59, 0.0  ;;  %v696_v61 = vmul.f32 0.01, %v688_v59 }
  0xf1   : > { %705 = vst [vmem:[%s234_s19 + $0x18] sm:$0xff] %v701_v60 }
  0xf2   : > { %v700_v62 = vsel %vm692_vm9, %v688_v59, %v696_v61 }
  0xf3   : > { %704 = vst [vmem:[%s234_s19 + $0x10] sm:$0xff] %v700_v62 }
  0xf4   : > { %1005 = shalt.err (!%p1002_p7)
}
  0xf5   : > { %s1006_s13 = scalar_lea.hbm %s1299_s11, 512  ;;  %s1010_s6 = scalar_lea.hbm %s1358_s4, 2048 }
  0xf6   : > { %p1007_p9 = scmp.ne.s32.totalorder %s1299_s11, %s1006_s13  ;;  %p1011_p12 = scmp.lt.s32.totalorder %s1299_s11, %s1358_s4 }
  0xf7   : > { %p1012_p13 = scmp.lt.s32.totalorder %s1010_s6, %s1006_s13 }
  0xf8   : > { %p1008_p10 = pnand %p1007_p9, %p1167_p3 }
  0xf9   : > { %p1013_p0 = por %p1012_p13, %p1011_p12 }
  0xfa   : > { %p1009_p11 = pneg %p1008_p10 }
  0xfc   : > { %p1014_p1 = pnand %p1013_p0, %p1009_p11 }
  0xfe   : > { %1017 = shalt.err (!%p1014_p1)
}
  0xff   : > { %s1088_s9 = smov 128   ;;  %s1089_s10 = smov 256  }
 0x100   : > { %s1090_s14 = smov 8  }
 0x101   : > { %917 = dma.vmem_to_hbm [thread:$0]  (%p1167_p3), %s1293_s8, 512, %s1299_s11, %s1303_s12, %s1088_s9, %s1089_s10, %s1090_s14  }
 0x102 PF: > { %p923_p2 = scmp.ge.s32.totalorder %s1084_s22, 2  ;;  %s736_s23 = sand.u32 1, %s1056_s15  }
 0x103   : > { %s737_s24 = scalar_lea.sflag [#allocation3], %s736_s23 }
 0x104   : > { %p920_p4 = pnand %p923_p2, %p1176_p8 }
 0x106   : > { %p921_p5 = pneg %p920_p4 }
 0x108   : > { %1051 = dma.done.wait (%p921_p5), %s737_s24, 512  }
 0x109   : > { %1053 = vsyncadd (%p921_p5), %s737_s24, 4294966784  ;;  %s17_s22 = sadd.s32 1, %s1084_s22   ;;  %s1361_s15 = smov %s1060_s16 }
 0x10a   : > { %p14_p6 = scmp.ge.s32.totalorder %s17_s22, 6   ;;  %s1362_s16 = smov %s1064_s17 }
 0x10b   : > { %s1363_s17 = smov %s1185_s7  ;;  %s1364_s18 = smov %s1076_s20 }
 0x10c   : > { %s1365_s19 = smov %s1080_s21  ;;  %s1366_s20 = smov %s1369_s25 }
 0x10d   : > { %s1367_s21 = smov %s1373_s26  ;;  %16 = sbr.rel (!%p14_p6) target bundleno = 5 (0x5), region = 80 }
 0x112   :  { %742 = vsyncpa [#allocation3], 1 }
 0x113   :  { %744 = vsyncpa [#allocation3 + $0x1], 1 }

</bundles_post_ra>
